<compile_context>
chip_gen: v7x
topology: tpu7x:2x2x1
jax: 0.10.0
libtpu: 0.0.40
codegen_flags: <defaults>
</compile_context>

<pallas_src>
import jax
import jax.numpy as jnp
import numpy as np
from jax.experimental import pallas as pl
from jax.experimental.pallas import tpu as pltpu


# -----------------------------------------------------------------------------
# Kernel 1: v_head projection  rewards[b, s] = sum_h hidden[b, s, h] * w[0, h]
# -----------------------------------------------------------------------------
def _vhead_kernel(h_ref, w_ref, out_ref, acc_ref):
    k = pl.program_id(2)  # H-reduction axis ("arbitrary")

    @pl.when(k == 0)
    def _():
        acc_ref[...] = jnp.zeros_like(acc_ref)

    # Output dim of the projection is 1, so keep the reduction on the VPU/XLU
    # (an MXU matmul with N=1 would waste 255/256 of the systolic array).
    # Inputs may be bf16; accumulate in f32.
    h = h_ref[...].astype(jnp.float32)              # (Bt, St, Ht)
    w = w_ref[...].astype(jnp.float32)              # (1, Ht)
    acc_ref[...] += jnp.sum(h * w[None, :, :], axis=-1)   # (Bt, St)

    @pl.when(k == pl.num_programs(2) - 1)
    def _():
        out_ref[...] = acc_ref[...].astype(out_ref.dtype)


# -----------------------------------------------------------------------------
# Kernel 2: epilogue — EOS / divergence indices, truncated loss, end scores.
# -----------------------------------------------------------------------------
def _make_epilogue_kernel(eos_id: int, bs: int, seq: int):
    def kernel(chosen_ref, rejected_ref, c_rew_ref, r_rew_ref,
               loss_ref, c_end_ref, r_end_ref):
        chosen = chosen_ref[...]                    # (bs, S) int32
        rejected = rejected_ref[...]                # (bs, S) int32
        c_rew = c_rew_ref[...]                      # (bs, S) f32 (chosen half)
        r_rew = r_rew_ref[...]                      # (bs, S) f32 (rejected half)

        idx = jax.lax.broadcasted_iota(jnp.int32, (bs, seq), 1)
        big = jnp.int32(seq)                        # fallback when no EOS

        # first EOS position per row (or seq if none)
        c_ind = jnp.min(jnp.where(chosen == eos_id, idx, big),
                        axis=-1, keepdims=True)     # (bs, 1)
        r_ind = jnp.min(jnp.where(rejected == eos_id, idx, big),
                        axis=-1, keepdims=True)     # (bs, 1)
        end_ind = jnp.maximum(c_ind, r_ind)         # (bs, 1)

        # first index where chosen differs from rejected
        div_ind = jnp.min(jnp.where(chosen != rejected, idx, big),
                          axis=-1, keepdims=True)   # (bs, 1)

        # loss over the truncated window [div_ind, end_ind)
        maskf = ((idx >= div_ind) & (idx < end_ind)).astype(jnp.float32)
        diff = c_rew - r_rew
        # numerically stable log(sigmoid(diff)) = -softplus(-diff)
        log_sig = -(jnp.maximum(-diff, 0.0)
                    + jnp.log(1.0 + jnp.exp(-jnp.abs(diff))))
        # guard against an empty window (would otherwise divide by zero)
        cnt = jnp.maximum(jnp.sum(maskf, axis=-1, keepdims=True), 1.0)
        per_pair = -jnp.sum(maskf * log_sig, axis=-1, keepdims=True) / cnt
        loss_ref[...] = jnp.sum(per_pair, axis=0, keepdims=True) / jnp.float32(bs)

        # end scores: reward at position end_ind - 1 (== truncated_reward[-1])
        last_mask = (idx == (end_ind - 1)).astype(jnp.float32)
        c_end_ref[...] = jnp.sum(c_rew * last_mask, axis=-1, keepdims=True)
        r_end_ref[...] = jnp.sum(r_rew * last_mask, axis=-1, keepdims=True)

    return kernel


# -----------------------------------------------------------------------------
# Tile selection: keep a hidden block around <= 8 MiB so double-buffered inputs
# stay inside every generation's scoped-VMEM defaults (v7x has 64 MiB physical).
# -----------------------------------------------------------------------------
def _choose_tiles(B, S, H, h_itemsize, override=None):
    if override is not None:
        return override
    bt = 8 if B % 8 == 0 else B                 # rewards out needs bt % 8 or bt == B
    ht = H
    for cand in (2048, 1024, 512):              # multiples of 128
        if H % cand == 0:
            ht = cand
            break
    budget = 8 * 1024 * 1024
    st = S
    for cand in (1024, 512, 256, 128):          # multiples of 128
        if S % cand == 0 and bt * cand * ht * h_itemsize <= budget:
            st = cand
            break
    return bt, st, ht


def gpt_reward_forward(chosen_ids, rejected_ids, hidden_states, w_v, eos_id,
                       tiles=None):
    """Training-path forward of GPTRewardModel (chosen != rejected per pair).

    hidden_states: [2*bs, S, H] backbone output (f32 or bf16), first half of
    the batch is "chosen", second half "rejected".  w_v: [1, H] v_head weight.
    Returns dict with 'loss', 'chosen_end_scores', 'rejected_end_scores'.
    """
    # TODO(synk): the per-example "inference" branch (chosen[i] == rejected[i]
    # exactly, early-continue) uses data-dependent Python control flow and is
    # not implemented; test data always takes the training path.
    # TODO(synk): data-dependent skipping of S-tiles outside [div_ind, end_ind)
    # (scalar-prefetch-driven index_map) would cut HBM reads further for long
    # prompts but requires value-dependent grid narrowing; not implemented.
    bs, seq = chosen_ids.shape
    B, S, H = hidden_states.shape
    assert B == 2 * bs and S == seq
    assert w_v.shape == (1, H)

    h_itemsize = jnp.dtype(hidden_states.dtype).itemsize
    bt, st, ht = _choose_tiles(B, S, H, h_itemsize, tiles)
    assert B % bt == 0 and S % st == 0 and H % ht == 0

    blk_bytes = bt * st * ht * h_itemsize
    vmem_limit = int(min(64 * 1024 * 1024, max(32 * 1024 * 1024, 4 * blk_bytes)))

    # ---- call 1: tiled, pipelined v_head projection --------------------------
    rewards = pl.pallas_call(
        _vhead_kernel,
        out_shape=jax.ShapeDtypeStruct((B, S), jnp.float32),
        grid_spec=pltpu.PrefetchScalarGridSpec(
            num_scalar_prefetch=0,
            grid=(B // bt, S // st, H // ht),
            in_specs=[
                pl.BlockSpec((bt, st, ht), lambda b, s, k: (b, s, k)),
                pl.BlockSpec((1, ht), lambda b, s, k: (0, k)),
            ],
            out_specs=pl.BlockSpec((bt, st), lambda b, s, k: (b, s)),
            scratch_shapes=[pltpu.VMEM((bt, st), jnp.float32)],
        ),
        compiler_params=pltpu.CompilerParams(
            dimension_semantics=("parallel", "parallel", "arbitrary"),
            vmem_limit_bytes=vmem_limit,
        ),
    )(hidden_states, w_v)

    # Split chosen / rejected halves in the wrapper (tiny XLA slice on (bs, S))
    # so the epilogue kernel never slices across sublane tile boundaries.
    c_rewards = rewards[:bs]
    r_rewards = rewards[bs:]

    # ---- call 2: tiny epilogue (indices, loss, end scores) --------------------
    epilogue = _make_epilogue_kernel(int(eos_id), bs, seq)
    loss, c_end, r_end = pl.pallas_call(
        epilogue,
        out_shape=(
            jax.ShapeDtypeStruct((1, 1), jnp.float32),    # loss
            jax.ShapeDtypeStruct((bs, 1), jnp.float32),   # chosen_end_scores
            jax.ShapeDtypeStruct((bs, 1), jnp.float32),   # rejected_end_scores
        ),
        grid_spec=pltpu.PrefetchScalarGridSpec(
            num_scalar_prefetch=0,
            grid=(1,),
            in_specs=[
                pl.BlockSpec((bs, seq), lambda i: (0, 0)),
                pl.BlockSpec((bs, seq), lambda i: (0, 0)),
                pl.BlockSpec((bs, seq), lambda i: (0, 0)),
                pl.BlockSpec((bs, seq), lambda i: (0, 0)),
            ],
            out_specs=[
                pl.BlockSpec((1, 1), lambda i: (0, 0)),
                pl.BlockSpec((bs, 1), lambda i: (0, 0)),
                pl.BlockSpec((bs, 1), lambda i: (0, 0)),
            ],
        ),
        compiler_params=pltpu.CompilerParams(dimension_semantics=("arbitrary",)),
    )(chosen_ids, rejected_ids, c_rewards, r_rewards)

    return {
        "loss": loss[0, 0],
        "chosen_end_scores": c_end[:, 0],
        "rejected_end_scores": r_end[:, 0],
    }


# -----------------------------------------------------------------------------
# Pure-numpy reference mirroring the PyTorch forward loop.
# -----------------------------------------------------------------------------
def _ref_forward(chosen, rejected, hidden, w, eos_id):
    chosen = np.asarray(chosen)
    rejected = np.asarray(rejected)
    hidden = np.asarray(hidden, np.float32)
    w = np.asarray(w, np.float32)
    bs, S = chosen.shape
    rewards = hidden @ w[0]                       # (2*bs, S)
    c_rew, r_rew = rewards[:bs], rewards[bs:]
    loss = 0.0
    c_end, r_end = [], []
    for i in range(bs):
        c_inds = np.nonzero(chosen[i] == eos_id)[0]
        c_ind = int(c_inds[0]) if len(c_inds) else S
        r_inds = np.nonzero(rejected[i] == eos_id)[0]
        r_ind = int(r_inds[0]) if len(r_inds) else S
        end_ind = max(c_ind, r_ind)
        div_ind = int(np.nonzero(chosen[i] != rejected[i])[0][0])
        assert div_ind > 0
        c_t = c_rew[i, div_ind:end_ind].astype(np.float64)
        r_t = r_rew[i, div_ind:end_ind].astype(np.float64)
        c_end.append(c_rew[i, end_ind - 1])
        r_end.append(r_rew[i, end_ind - 1])
        loss += -np.log(1.0 / (1.0 + np.exp(-(c_t - r_t)))).mean()
    return loss / bs, np.array(c_end), np.array(r_end)


def _make_test_case(key, bs, S, H, eos_id, prefix_len=6):
    k1, k2, k3, k4 = jax.random.split(key, 4)
    # Shared prompt prefix, then the responses diverge. Token range excludes EOS.
    base = jax.random.randint(k1, (bs, S), 3, 100, dtype=jnp.int32)
    chosen_ids = base
    rejected_ids = base.at[:, prefix_len:].set(
        jax.random.randint(k2, (bs, S - prefix_len), 3, 100, dtype=jnp.int32))
    # Deterministic EOS placements (pair 1's chosen sequence has no EOS ->
    # falls back to S, matching the PyTorch behaviour).
    for i in range(bs):
        if i != 1:
            chosen_ids = chosen_ids.at[i, 10 + (i % 4)].set(eos_id)
        rejected_ids = rejected_ids.at[i, 12 + (i % 3)].set(eos_id)
    hidden_states = jax.random.normal(k3, (2 * bs, S, H), jnp.float32)
    w_v = (jax.random.normal(k4, (1, H), jnp.float32) * 0.02).astype(jnp.float32)
    return chosen_ids, rejected_ids, hidden_states, w_v


def _run_and_check(chosen_ids, rejected_ids, hidden_states, w_v, eos_id,
                   tiles=None, rtol=1e-5, atol=1e-5):
    out = gpt_reward_forward(chosen_ids, rejected_ids, hidden_states, w_v,
                             eos_id, tiles=tiles)
    jax.block_until_ready(out["loss"])
    ref_loss, ref_c, ref_r = _ref_forward(chosen_ids, rejected_ids,
                                          hidden_states, w_v, eos_id)
    np.testing.assert_allclose(np.asarray(out["loss"]), ref_loss,
                               rtol=rtol, atol=atol)
    np.testing.assert_allclose(np.asarray(out["chosen_end_scores"]), ref_c,
                               rtol=rtol, atol=atol)
    np.testing.assert_allclose(np.asarray(out["rejected_end_scores"]), ref_r,
                               rtol=rtol, atol=atol)


if __name__ == "__main__":
    EOS_ID = 2
    key = jax.random.PRNGKey(0)
    k_a, k_b = jax.random.split(key)

    # Test 1: small shapes, single-block grid (same scale as the module's spec).
    c1, r1, h1, w1 = _make_test_case(k_a, bs=2, S=16, H=32, eos_id=EOS_ID)
    _run_and_check(c1, r1, h1, w1, EOS_ID, rtol=1e-5, atol=1e-5)

    # Test 2: exercise the tiled / pipelined path: grid = (2, 2, 2) with
    # (Bt, St, Ht) = (8, 128, 128) tiles and the H-reduction accumulator.
    c2, r2, h2, w2 = _make_test_case(k_b, bs=8, S=256, H=256, eos_id=EOS_ID)
    _run_and_check(c2, r2, h2, w2, EOS_ID, tiles=(8, 128, 128),
                   rtol=1e-4, atol=1e-4)

    print("KERNEL_OK")
</pallas_src>

<mosaic_0001>
module attributes {stable_mosaic.version = 11 : i64} {
  func.func @_vhead_kernel(%arg0: i32, %arg1: i32, %arg2: i32, %arg3: memref<4x16x32xf32, #tpu.memory_space<vmem>>, %arg4: memref<1x32xf32, #tpu.memory_space<vmem>>, %arg5: memref<4x16xf32, #tpu.memory_space<vmem>>, %arg6: memref<4x16xf32, #tpu.memory_space<vmem>>) attributes {dimension_semantics = [#tpu.dimension_semantics<parallel>, #tpu.dimension_semantics<parallel>, #tpu.dimension_semantics<arbitrary>], iteration_bounds = array<i64: 1, 1, 1>, scalar_prefetch = 0 : i64, scratch_operands = 1 : i64, tpu.core_type = #tpu.core_type<tc>, window_params = [{transform_indices = @transform_0, window_bounds = array<i64: 4, 16, 32>}, {transform_indices = @transform_1, window_bounds = array<i64: 1, 32>}, {transform_indices = @transform_2, window_bounds = array<i64: 4, 16>}]} {
    %c0_i32 = arith.constant 0 : i32
    %0 = arith.cmpi eq, %arg2, %c0_i32 : i32
    %1 = arith.extui %0 : i1 to i32
    %c0_i32_0 = arith.constant 0 : i32
    %2 = arith.cmpi ne, %1, %c0_i32_0 : i32
    scf.if %2 {
      %cst_11 = arith.constant 0.000000e+00 : f32
      %15 = vector.broadcast %cst_11 : f32 to vector<4x16xf32>
      %c0_12 = arith.constant 0 : index
      %c0_13 = arith.constant 0 : index
      %16 = vector.load %arg6[%c0_12, %c0_13] : memref<4x16xf32, #tpu.memory_space<vmem>>, vector<4x16xf32>
      tpu.vector_store %arg6[%c0_12, %c0_13], %15 {strides = array<i32>} : memref<4x16xf32, #tpu.memory_space<vmem>>, vector<4x16xf32>,
    } else {
    }
    %c0 = arith.constant 0 : index
    %c0_1 = arith.constant 0 : index
    %c0_2 = arith.constant 0 : index
    %3 = vector.load %arg3[%c0, %c0_1, %c0_2] : memref<4x16x32xf32, #tpu.memory_space<vmem>>, vector<4x16x32xf32>
    %c0_3 = arith.constant 0 : index
    %c0_4 = arith.constant 0 : index
    %4 = vector.load %arg4[%c0_3, %c0_4] : memref<1x32xf32, #tpu.memory_space<vmem>>, vector<1x32xf32>
    %c0_5 = arith.constant 0 : index
    %c0_6 = arith.constant 0 : index
    %5 = vector.load %arg6[%c0_5, %c0_6] : memref<4x16xf32, #tpu.memory_space<vmem>>, vector<4x16xf32>
    %6 = vector.shape_cast %4 : vector<1x32xf32> to vector<1x1x32xf32>
    %7 = vector.broadcast %6 : vector<1x1x32xf32> to vector<4x16x32xf32>
    %8 = arith.mulf %3, %7 : vector<4x16x32xf32>
    %cst = arith.constant dense<0.000000e+00> : vector<4x16xf32>
    %9 = vector.multi_reduction <add>, %8, %cst [2] : vector<4x16x32xf32> to vector<4x16xf32>
    %10 = arith.addf %5, %9 : vector<4x16xf32>
    %c0_7 = arith.constant 0 : index
    %c0_8 = arith.constant 0 : index
    %11 = vector.load %arg6[%c0_7, %c0_8] : memref<4x16xf32, #tpu.memory_space<vmem>>, vector<4x16xf32>
    tpu.vector_store %arg6[%c0_7, %c0_8], %10 {strides = array<i32>} : memref<4x16xf32, #tpu.memory_space<vmem>>, vector<4x16xf32>,
    %c0_i32_9 = arith.constant 0 : i32
    %12 = arith.cmpi eq, %arg2, %c0_i32_9 : i32
    %13 = arith.extui %12 : i1 to i32
    %c0_i32_10 = arith.constant 0 : i32
    %14 = arith.cmpi ne, %13, %c0_i32_10 : i32
    scf.if %14 {
      %c0_11 = arith.constant 0 : index
      %c0_12 = arith.constant 0 : index
      %15 = vector.load %arg6[%c0_11, %c0_12] : memref<4x16xf32, #tpu.memory_space<vmem>>, vector<4x16xf32>
      %c0_13 = arith.constant 0 : index
      %c0_14 = arith.constant 0 : index
      %16 = vector.load %arg5[%c0_13, %c0_14] : memref<4x16xf32, #tpu.memory_space<vmem>>, vector<4x16xf32>
      tpu.vector_store %arg5[%c0_13, %c0_14], %15 {strides = array<i32>} : memref<4x16xf32, #tpu.memory_space<vmem>>, vector<4x16xf32>,
    } else {
    }
    return
  }
  func.func @transform_0(%arg0: i32, %arg1: i32, %arg2: i32) -> (i32, i32, i32) {
    %c0_i32 = arith.constant 0 : i32
    return %arg0, %arg1, %arg2 : i32, i32, i32
  }
  func.func @transform_1(%arg0: i32, %arg1: i32, %arg2: i32) -> (i32, i32) {
    %c0_i32 = arith.constant 0 : i32
    %c0_i32_0 = arith.constant 0 : i32
    return %c0_i32, %arg2 : i32, i32
  }
  func.func @transform_2(%arg0: i32, %arg1: i32, %arg2: i32) -> (i32, i32) {
    %c0_i32 = arith.constant 0 : i32
    return %arg0, %arg1 : i32, i32
  }
}

</mosaic_0001>

<bundles_post_ra>
// kernel: tpu_custom_call.1
= control target key start
LH: loop header
LB: loop body
LE: loop exit
PB: predicated region body
PF: predicated region fallthrough
CT: control target
= control target key end

     0   :  { %7 = vsyncpa [#allocation4], 0  ;;  %s275_s0 = inlined_call_operand.hbm [shape: f32[4,16,32], index: 0, kind: input, shape index: {}]   ;;  %s276_s1 = inlined_call_operand.vmem [shape: f32[1,32], index: 1, kind: input, shape index: {}]   ;;  %s277_s2 = inlined_call_operand.hbm [shape: f32[4,16], index: 2, kind: output, shape index: {}]  }
   0x1   :  { %8 = vsyncpa [#allocation5], 0  ;;  %s213_s9 = smov [#allocation3]   ;;  %s165_s13 = scalar_lea.hbm %s275_s0, 1024 }
   0x2   :  { %s14_s10 = sshll.u32 %s213_s9, 4  ;;  %p166_p0 = scmp.ne.s32.totalorder %s275_s0, %s165_s13  ;;  %s15_s10 = int_to_ptr.vmem [resolvable:$true] %s14_s10 }
   0x3   :  { %p169_p1 = scmp.lt.u32.totalorder %s165_s13, %s275_s0 }
   0x5   :  { %p171_p2 = pnand %p169_p1, %p166_p0 }
   0x7   :  { %174 = shalt.err (!%p171_p2)
}
   0x8   :  { %s175_s18 = scalar_lea.vmem %s15_s10, 1024  ;;  %p180_p4 = scmp.lt.s32.totalorder %s15_s10, %s15_s10 }
   0x9   :  { %p176_p3 = scmp.ne.s32.totalorder %s15_s10, %s175_s18  ;;  %p181_p5 = scmp.lt.s32.totalorder %s175_s18, %s175_s18 }
   0xb   :  { %p182_p6 = por %p181_p5, %p180_p4 }
   0xd   :  { %p183_p7 = pnand %p182_p6, %p176_p3 }
   0xf   :  { %186 = shalt.err (!%p183_p7)
}
  0x10   :  { %s214_s19 = smov 128   ;;  %s215_s20 = smov 8  }
  0x11   :  { %20 = dma.hbm_to_vmem [thread:$0]  %s275_s0, 1024, %s15_s10, [#allocation4], %s214_s19, %s214_s19, %s215_s20  }
  0x12   :  { %209 = dma.done.wait [#allocation4], 1024  }
  0x13   :  { %210 = vsyncadd [#allocation4], 4294966272  ;;  %v34_v0 = vld [vmem:[#allocation3 + $0x10] sm:$0xff]  ;;  %v159_v1 = vld [vmem:[%s276_s1] ss:$0 sm:$0xff]  ;;  %vm56_vm0 = vcmask 261120   ;;  %v89_v26 = vlaneseq }
  0x14   :  { %v32_v2 = vld [vmem:[#allocation3] sm:$0xff]  ;;  %v50_v3 = vmul.f32 %v159_v1, %v34_v0  ;;  %v35_v5 = vld [vmem:[#allocation3 + $0x18] sm:$0xff]  ;;  %v33_v6 = vld [vmem:[#allocation3 + $0x8] sm:$0xff]  ;;  %vm30_vm1 = vcmask 125952   ;;  %v216_v25 = vmov 0.0   ;;  %vm100_vm2 = vcmask 130112  }
  0x15   :  { %v48_v4 = vmul.f32 %v159_v1, %v32_v2  ;;  %v51_v7 = vmul.f32 %v159_v1, %v35_v5  ;;  %v49_v8 = vmul.f32 %v159_v1, %v33_v6  ;;  %v37_v9 = vld [vmem:[#allocation3 + $0x28] sm:$0xff]  ;;  %v36_v10 = vld [vmem:[#allocation3 + $0x20] sm:$0xff]  ;;  %v39_v17 = vld [vmem:[#allocation3 + $0x38] sm:$0xff]  ;;  %31 = vst.msk [vmem:[#allocation2] sm:$0xf] %vm30_vm1, %v216_v25  ;;  %v90_v27 = vand.u32 127, %v89_v26 }
  0x16   :  { %v63_v11 = vsel %vm56_vm0, %v50_v3, 0.0  ;;  %v53_v15 = vmul.f32 %v159_v1, %v37_v9  ;;  %v52_v16 = vmul.f32 %v159_v1, %v36_v10  ;;  %v38_v18 = vld [vmem:[#allocation3 + $0x30] sm:$0xff]  ;;  %v55_v21 = vmul.f32 %v159_v1, %v39_v17  ;;  %s217_s0 = smov [#allocation6]  }
  0x17   :  { %v57_v12 = vsel %vm56_vm0, %v48_v4, 0.0  ;;  %64 = vadd.xlane.f32.xlu1 %v63_v11  ;;  %v66_v13 = vsel %vm56_vm0, %v51_v7, 0.0  ;;  %v60_v14 = vsel %vm56_vm0, %v49_v8, 0.0  ;;  %v54_v22 = vmul.f32 %v159_v1, %v38_v18  ;;  %s150_s1 = sshll.u32 %s217_s0, 4  ;;  %s151_s1 = int_to_ptr.vmem [resolvable:$true] %s150_s1 }
  0x18   :  { %58 = vadd.xlane.f32.xlu0 %v57_v12  ;;  %v72_v19 = vsel %vm56_vm0, %v53_v15, 0.0  ;;  %v69_v20 = vsel %vm56_vm0, %v52_v16, 0.0  ;;  %v78_v23 = vsel %vm56_vm0, %v55_v21, 0.0  ;;  %v95_v28 = vadd.s32 4294967288, %v90_v27  ;;  %s187_s25 = scalar_lea.vmem %s151_s1, 64  ;;  %p192_p9 = scmp.lt.s32.totalorder %s151_s1, %s151_s1 }
  0x19   :  { %v75_v24 = vsel %vm56_vm0, %v54_v22, 0.0  ;;  %v92_v31 = vshrl.u32 %v89_v26, 7  ;;  %vm129_vm3 = vcmask 1041409   ;;  %vm131_vm4 = vcmask 1042434   ;;  %p188_p8 = scmp.ne.s32.totalorder %s151_s1, %s187_s25  ;;  %p193_p10 = scmp.lt.s32.totalorder %s187_s25, %s187_s25 }
  0x1a   :  { %vm133_vm5 = vcmask 1043459  }
  0x1b   :  { %67 = vadd.xlane.f32.xlu1 %v66_v13  ;;  %v98_v32 = vsub.s32 %v95_v28, %v92_v31  ;;  %v93_v35 = vsub.s32 %v90_v27, %v92_v31  ;;  %p194_p11 = por %p193_p10, %p192_p9 }
  0x1c   :  { %61 = vadd.xlane.f32.xlu0 %v60_v14  ;;  %v41_v52 = vld [vmem:[#allocation2] sm:$0xf] }
  0x1d   :  { %p195_p12 = pnand %p194_p11, %p188_p8 }
  0x1f   :  { %73 = vadd.xlane.f32.xlu1 %v72_v19 }
  0x20   :  { %70 = vadd.xlane.f32.xlu0 %v69_v20 }
  0x23   :  { %79 = vadd.xlane.f32.xlu1 %v78_v23 }
  0x24   :  { %76 = vadd.xlane.f32.xlu0 %v75_v24 }
  0xa4   :  { %v65_v29 = vpop.xlane.xlu1 %64 }
  0xa5   :  { %v59_v30 = vpop.xlane.xlu0 %58  ;;  %v105_v40 = vrot.slane %v65_v29, %v93_v35 }
  0xa6   :  { %v94_v41 = vrot.slane %v59_v30, %v93_v35 }
  0xa8   :  { %v68_v33 = vpop.xlane.xlu1 %67 }
  0xa9   :  { %v62_v34 = vpop.xlane.xlu0 %61  ;;  %v109_v36 = vrot.slane %v68_v33, %v98_v32 }
  0xaa   :  { %v99_v37 = vrot.slane %v62_v34, %v98_v32 }
  0xab   :  { %v110_v44 = vsel %vm100_vm2, %v109_v36, %v105_v40 }
  0xac   :  { %v74_v38 = vpop.xlane.xlu1 %73  ;;  %v101_v45 = vsel %vm100_vm2, %v99_v37, %v94_v41 }
  0xad   :  { %v71_v39 = vpop.xlane.xlu0 %70  ;;  %v118_v42 = vrot.slane %v74_v38, %v98_v32  ;;  %v130_v51 = vsel %vm129_vm3, %v110_v44, %v101_v45 }
  0xae   :  { %v114_v43 = vrot.slane %v71_v39, %v93_v35 }
  0xb0   :  { %v119_v46 = vsel %vm100_vm2, %v118_v42, %v114_v43  ;;  %v80_v47 = vpop.xlane.xlu1 %79 }
  0xb1   :  { %v77_v48 = vpop.xlane.xlu0 %76  ;;  %v127_v49 = vrot.slane %v80_v47, %v98_v32  ;;  %v132_v53 = vsel %vm131_vm4, %v119_v46, %v130_v51 }
  0xb2   :  { %v123_v50 = vrot.slane %v77_v48, %v93_v35 }
  0xb4   :  { %v128_v54 = vsel %vm100_vm2, %v127_v49, %v123_v50 }
  0xb5   :  { %v134_v55 = vsel %vm133_vm5, %v128_v54, %v132_v53 }
  0xb6   :  { %v136_v56 = vadd.f32 %v134_v55, %v41_v52 }
  0xb8   :  { %138 = vst.msk [vmem:[#allocation2] sm:$0xf] %vm30_vm1, %v136_v56 }
  0xbf   :  { %v142_v57 = vld [vmem:[#allocation2] sm:$0xf] }
  0xc0   :  { %143 = vst.msk [vmem:[#allocation6] sm:$0xf] %vm30_vm1, %v142_v57 }
  0xc1   :  { %198 = shalt.err (!%p195_p12)
}
  0xc2   :  { %s199_s28 = scalar_lea.hbm %s277_s2, 64 }
  0xc3   :  { %p200_p13 = scmp.ne.s32.totalorder %s277_s2, %s199_s28  ;;  %p203_p0 = scmp.lt.u32.totalorder %s199_s28, %s277_s2 }
  0xc5   :  { %p205_p1 = pnand %p203_p0, %p200_p13 }
  0xc7   :  { %208 = shalt.err (!%p205_p1)
}
  0xc8   :  { %153 = dma.vmem_to_hbm [thread:$0]  %s151_s1, 64, %s277_s2, [#allocation5]  }
  0xc9   :  { %211 = dma.done.wait [#allocation5], 64  }
  0xca   :  { %212 = vsyncadd [#allocation5], 4294967232 }
  0xcb   :  { %157 = vsyncpa [#allocation4], 1 }
  0xcc   :  { %158 = vsyncpa [#allocation5], 1 }

</bundles_post_ra>
